<compile_context>
chip_gen: v7x
topology: tpu7x:2x2x1
jax: 0.10.0
libtpu: 0.0.40
codegen_flags: <defaults>
</compile_context>

<pallas_src>
import numpy as np
import jax
import jax.numpy as jnp
from jax.experimental import pallas as pl
from jax.experimental.pallas import tpu as pltpu

# ---------------- model hyper-parameters (small, deterministic) ----------------
N_NODES = 8          # input_channel == number of graph nodes
SEQ_LEN = 16         # time steps
BATCH = 2
EMB_DIM = 16         # embedding_dim
TOP_K = 4            # top_k (scaled down to fit N_NODES)
GRAPH_ALPHA = 3.0    # graph_alpha
GC_DEPTH = 1         # gc_depth
PROP_ALPHA = 0.05    # mixprop retain ratio (MTGNN default)
C1 = 32              # wave_conv_out_dim[0]
NEG_SLOPE = 0.01     # nn.LeakyReLU default negative_slope
NT = N_NODES * SEQ_LEN          # 128 -> exactly one lane width
BC = C1 * BATCH                 # 64  -> sublane rows of the stacked activations
NB = 9 * BATCH                  # 18  -> rows of the folded conv/mixprop output


def _leaky(v):
    return jnp.maximum(v, NEG_SLOPE * v)


# --------------------------------- Pallas kernel ---------------------------------
def wavegc_kernel(x_ref, pm_ref, wbig_ref, cols_ref, o_ref):
    # x_ref:    (B, NT)        lanes = node*time (node-major), sublanes = batch
    # pm_ref:   (NT + 9, NT)   rows [0:NT]  = graph propagation matrix kron(a_norm.T, I_T)
    #                          rows [NT:..] = zero-padding masks of the 3x3 SAME conv
    # wbig_ref: ((D+1)*NB, BC) folded (3x3 conv channel taps o mixprop MLP) weights,
    #                          kron'ed with I_B so one matmul covers the whole batch
    # cols_ref: (BC, 4)        col0 = w1 (batch-expanded), col1 = b1,
    #                          col2[:NB] = w3 @ bm (folded bias), col3[0] = conv bias b3
    x = x_ref[...]                                             # (B, NT)

    # conv1_gcn_input1: 1x1 conv (1 -> C1) + LeakyReLU, batch stacked on sublanes
    # (row order c*B + b).  Replicate the B input rows C1 times with log2(C1) aligned
    # sublane concats (C1 is a power of two), then a single fused scale/bias.
    x_rep = x
    while x_rep.shape[0] < BC:
        x_rep = jnp.concatenate([x_rep, x_rep], axis=0)
    x_rep = x_rep[:BC]                                         # (BC, NT), row c*B+b = x[b]
    h = _leaky(cols_ref[:, 0:1] * x_rep + cols_ref[:, 1:2])    # (BC, NT)

    # Folded (3x3-conv channel contraction) o (mixprop MLP) o (graph propagation):
    #   y[k*B + b, :] = sum_i wfold_i[k, :] @ (h_b @ prop^i) + (w3 @ bm)[k]
    prop = pm_ref[0:NT, :]                                     # (NT, NT)
    y = jnp.dot(wbig_ref[0:NB, :], h, preferred_element_type=jnp.float32)
    hp = h
    for i in range(1, GC_DEPTH + 1):
        hp = jnp.dot(hp, prop, preferred_element_type=jnp.float32)      # graph hop i
        y = y + jnp.dot(wbig_ref[i * NB:(i + 1) * NB, :], hp,
                        preferred_element_type=jnp.float32)
    y = y + cols_ref[0:NB, 2:3]                                # (NB, NT)

    # Spatial part of the 3x3 SAME conv: rotate each tap's rows by its (dy, dx) offset
    # on the flattened (node, time) lane axis, zero the positions that fall outside the
    # zero-padded image, and accumulate.  One (B, NT) roll per tap (center tap skipped).
    acc = None
    for k in range(9):
        dy, dx = k // 3 - 1, k % 3 - 1
        s = dy * SEQ_LEN + dx                                  # lane offset of tap (dy, dx)
        tap = y[k * BATCH:(k + 1) * BATCH, :]                  # (B, NT)
        if s != 0:
            tap = pltpu.roll(tap, shift=(-s) % NT, axis=1)     # tap[b, p] <- y[.., p + s]
            tap = tap * pm_ref[NT + k:NT + k + 1, :]           # zero the padding region
        acc = tap if acc is None else acc + tap

    # wave_generate_high_layer1 bias + LeakyReLU
    o_ref[...] = _leaky(acc + cols_ref[0:1, 3:4])              # (B, NT)


# ------------------------------- wrapper / glue -----------------------------------
def pallas_forward(x, pm, wbig, cols):
    b = x.shape[0]
    assert b == BATCH
    # torch: unsqueeze(1) + transpose(2,3) -> [B,1,N,T]; flatten node/time onto lanes.
    x2d = jnp.transpose(x, (0, 2, 1)).reshape(b, NT)

    out = pl.pallas_call(
        wavegc_kernel,
        out_shape=jax.ShapeDtypeStruct((b, NT), jnp.float32),
        # grid-less call: every operand is a whole-array VMEM block -> one DMA per
        # operand, no per-batch grid-step overhead, no redundant double-buffering.
    )(x2d, pm, wbig, cols)

    # squeeze(1) + transpose(1,2): [B,1,N,T] -> [B,T,N]
    return jnp.transpose(out.reshape(b, N_NODES, SEQ_LEN), (0, 2, 1))


def init_params(key):
    ks = jax.random.split(key, 12)
    sc = 0.1
    p = {
        "emb1":  jax.random.normal(ks[0], (N_NODES, EMB_DIM), jnp.float32) * sc,
        "emb2":  jax.random.normal(ks[1], (N_NODES, EMB_DIM), jnp.float32) * sc,
        "lin1_w": jax.random.normal(ks[2], (EMB_DIM, EMB_DIM), jnp.float32) * sc,
        "lin1_b": jax.random.normal(ks[3], (EMB_DIM,), jnp.float32) * sc,
        "lin2_w": jax.random.normal(ks[4], (EMB_DIM, EMB_DIM), jnp.float32) * sc,
        "lin2_b": jax.random.normal(ks[5], (EMB_DIM,), jnp.float32) * sc,
        # conv1_gcn_input1: Conv2d(1 -> 32, 1x1)
        "w1": jax.random.normal(ks[6], (C1, 1), jnp.float32) * sc,
        "b1": jax.random.normal(ks[7], (C1, 1), jnp.float32) * sc,
        # mixprop MLP: Conv2d((gc_depth+1)*32 -> 32, 1x1), stored per-hop
        "wm": jax.random.normal(ks[8], (GC_DEPTH + 1, C1, C1), jnp.float32) * sc,
        "bm": jax.random.normal(ks[9], (C1, 1), jnp.float32) * sc,
        # wave_generate_high_layer1: Conv2d(32 -> 1, 3x3), taps flattened row-major
        "w3r": jax.random.normal(ks[10], (9, C1), jnp.float32) * sc,
        "b3":  jax.random.normal(ks[11], (1, 1), jnp.float32) * sc,
    }
    # zero-padding validity masks for the 3x3 conv on the flattened (N, T) grid
    n_idx = jnp.arange(NT) // SEQ_LEN
    t_idx = jnp.arange(NT) % SEQ_LEN
    masks = []
    for dy in (-1, 0, 1):
        for dx in (-1, 0, 1):
            ok = ((n_idx + dy >= 0) & (n_idx + dy < N_NODES) &
                  (t_idx + dx >= 0) & (t_idx + dx < SEQ_LEN))
            masks.append(ok.astype(jnp.float32))
    p["mask9"] = jnp.stack(masks, axis=0)                      # (9, NT)
    return p


def build_graph(params, idx):
    # MTGNN-style graph_constructor (EmbeddingGraph)
    nv1 = jnp.tanh(GRAPH_ALPHA * (params["emb1"][idx] @ params["lin1_w"].T + params["lin1_b"]))
    nv2 = jnp.tanh(GRAPH_ALPHA * (params["emb2"][idx] @ params["lin2_w"].T + params["lin2_b"]))
    a = nv1 @ nv2.T - nv2 @ nv1.T
    adj = jax.nn.relu(jnp.tanh(GRAPH_ALPHA * a))
    _, top_idx = jax.lax.top_k(adj, TOP_K)
    n = adj.shape[0]
    mask = jnp.zeros_like(adj).at[jnp.arange(n)[:, None], top_idx].set(1.0)
    return adj * mask


def build_prop_matrix(adj):
    n = adj.shape[0]
    adj_i = adj + jnp.eye(n, dtype=adj.dtype)
    a_norm = adj_i / adj_i.sum(axis=1, keepdims=True)
    # node propagation h[c,w,l] -> sum_w a_norm[v,w] h[c,w,l] as a single flat matmul
    return jnp.kron(a_norm.T, jnp.eye(SEQ_LEN, dtype=adj.dtype))   # (NT, NT)


def fold_params(params, adj):
    """Host-side (one-off) parameter folding + packing into 3 kernel operands."""
    d = GC_DEPTH
    alpha = PROP_ALPHA
    prop = build_prop_matrix(adj)                              # (NT, NT)

    # mixprop:  z = sum_j wm[j] @ h_j + bm,  h_j = a*h0 + (1-a)*h_{j-1} @ prop
    # =>        z = sum_i W_i @ (h0 @ prop^i) + bm   (exact linear algebra)
    coef = np.zeros((d + 1, d + 1), np.float32)
    coef[0, 0] = 1.0
    for j in range(1, d + 1):
        coef[j, 0] += alpha
        coef[j, 1:j + 1] += (1.0 - alpha) * coef[j - 1, 0:j]

    w3 = params["w3r"]                                         # (9, C1)
    wfold = []
    for i in range(d + 1):
        wi = sum(float(coef[j, i]) * params["wm"][j] for j in range(d + 1))   # (C1, C1)
        wfold.append(w3 @ wi)                                  # (9, C1): 3x3 taps o MLP o W_i

    eye_b = jnp.eye(BATCH, dtype=jnp.float32)
    # batch-stacked (sublane) form: kron with I_B so one matmul covers all batches
    wbig = jnp.concatenate([jnp.kron(wf, eye_b) for wf in wfold], axis=0)     # ((d+1)*NB, BC)

    by = w3 @ params["bm"]                                     # (9, 1) conv-of-bias
    col_w1 = jnp.repeat(params["w1"], BATCH, axis=0)           # (BC, 1) row c*B+b -> w1[c]
    col_b1 = jnp.repeat(params["b1"], BATCH, axis=0)           # (BC, 1)
    col_by = jnp.zeros((BC, 1), jnp.float32).at[0:NB].set(jnp.repeat(by, BATCH, axis=0))
    col_b3 = jnp.zeros((BC, 1), jnp.float32).at[0, 0].set(params["b3"][0, 0])
    cols = jnp.concatenate([col_w1, col_b1, col_by, col_b3], axis=1)          # (BC, 4)

    pm = jnp.concatenate([prop, params["mask9"]], axis=0)      # (NT + 9, NT)
    return pm, wbig, cols


# --------------------------- pure-JAX reference (check) ---------------------------
def reference_forward(x, adj, params):
    xc = jnp.transpose(x, (0, 2, 1))[:, None, :, :]            # [B,1,N,T]
    w1 = params["w1"][:, 0]
    b1 = params["b1"][:, 0]
    h0 = _leaky(xc * w1[None, :, None, None] + b1[None, :, None, None])   # [B,C1,N,T]
    adj_i = adj + jnp.eye(adj.shape[0], dtype=adj.dtype)
    a_norm = adj_i / adj_i.sum(axis=1, keepdims=True)
    hs = [h0]
    h = h0
    for _ in range(GC_DEPTH):
        h = PROP_ALPHA * h0 + (1.0 - PROP_ALPHA) * jnp.einsum('vw,bcwl->bcvl', a_norm, h)
        hs.append(h)
    z = params["bm"][None, :, 0, None, None]
    for j, hj in enumerate(hs):
        z = z + jnp.einsum('oc,bcnl->bonl', params["wm"][j], hj)
    w_conv = jnp.transpose(params["w3r"].reshape(3, 3, C1), (2, 0, 1))[None]   # (1,C1,3,3)
    rec4 = jax.lax.conv_general_dilated(
        z, w_conv, window_strides=(1, 1), padding='SAME',
        dimension_numbers=('NCHW', 'OIHW', 'NCHW')) + params["b3"][0, 0]
    rec4 = _leaky(rec4)
    return jnp.transpose(rec4[:, 0], (0, 2, 1))                # [B,T,N]


if __name__ == "__main__":
    key = jax.random.PRNGKey(0)
    pkey, xkey = jax.random.split(key)
    params = init_params(pkey)

    x = jax.random.normal(xkey, (BATCH, SEQ_LEN, N_NODES), jnp.float32)
    idx = jnp.arange(N_NODES)

    adj = build_graph(params, idx)           # graph construction (tiny, host glue)
    pm, wbig, cols = fold_params(params, adj)

    rec = pallas_forward(x, pm, wbig, cols)
    rec = jax.block_until_ready(rec)

    assert rec.shape == (BATCH, SEQ_LEN, N_NODES)
    ref = reference_forward(x, adj, params)
    np.testing.assert_allclose(np.asarray(rec), np.asarray(ref), rtol=1e-2, atol=1e-2)
    print("KERNEL_OK")
</pallas_src>

<mosaic_0001>
module attributes {stable_mosaic.version = 11 : i64} {
  func.func @wavegc_kernel(%arg0: memref<2x128xf32, #tpu.memory_space<vmem>>, %arg1: memref<137x128xf32, #tpu.memory_space<vmem>>, %arg2: memref<36x64xf32, #tpu.memory_space<vmem>>, %arg3: memref<64x4xf32, #tpu.memory_space<vmem>>, %arg4: memref<2x128xf32, #tpu.memory_space<vmem>>) attributes {dimension_semantics = [], scalar_prefetch = 0 : i64, scratch_operands = 0 : i64, tpu.core_type = #tpu.core_type<tc>} {
    %c0 = arith.constant 0 : index
    %c0_0 = arith.constant 0 : index
    %0 = vector.load %arg0[%c0, %c0_0] : memref<2x128xf32, #tpu.memory_space<vmem>>, vector<2x128xf32>
    %1 = tpu.concatenate %0, %0 in 0 : vector<2x128xf32>, vector<2x128xf32> -> vector<4x128xf32>
    %2 = tpu.concatenate %1, %1 in 0 : vector<4x128xf32>, vector<4x128xf32> -> vector<8x128xf32>
    %3 = tpu.concatenate %2, %2 in 0 : vector<8x128xf32>, vector<8x128xf32> -> vector<16x128xf32>
    %4 = tpu.concatenate %3, %3 in 0 : vector<16x128xf32>, vector<16x128xf32> -> vector<32x128xf32>
    %5 = tpu.concatenate %4, %4 in 0 : vector<32x128xf32>, vector<32x128xf32> -> vector<64x128xf32>
    %c0_1 = arith.constant 0 : index
    %c0_2 = arith.constant 0 : index
    %6 = vector.load %arg3[%c0_1, %c0_2] : memref<64x4xf32, #tpu.memory_space<vmem>>, vector<64x1xf32>
    %7 = vector.broadcast %6 : vector<64x1xf32> to vector<64x128xf32>
    %8 = arith.mulf %7, %5 : vector<64x128xf32>
    %c0_3 = arith.constant 0 : index
    %c1 = arith.constant 1 : index
    %9 = vector.load %arg3[%c0_3, %c1] : memref<64x4xf32, #tpu.memory_space<vmem>>, vector<64x1xf32>
    %10 = vector.broadcast %9 : vector<64x1xf32> to vector<64x128xf32>
    %11 = arith.addf %8, %10 : vector<64x128xf32>
    %cst = arith.constant 0.00999999977 : f32
    %12 = vector.broadcast %cst : f32 to vector<64x128xf32>
    %13 = arith.mulf %12, %11 : vector<64x128xf32>
    %14 = arith.maximumf %11, %13 : vector<64x128xf32>
    %c0_4 = arith.constant 0 : index
    %c0_5 = arith.constant 0 : index
    %15 = vector.load %arg1[%c0_4, %c0_5] : memref<137x128xf32, #tpu.memory_space<vmem>>, vector<128x128xf32>
    %c0_6 = arith.constant 0 : index
    %c0_7 = arith.constant 0 : index
    %16 = vector.load %arg2[%c0_6, %c0_7] : memref<36x64xf32, #tpu.memory_space<vmem>>, vector<18x64xf32>
    %cst_8 = arith.constant dense<0.000000e+00> : vector<18x128xf32>
    %17 = tpu.matmul %16, %14, %cst_8 {dimension_numbers = #tpu.dot_dimension_numbers<[1], [0], [0], [1], [0, 0, 1, 1], [], []>} : vector<18x64xf32>, vector<64x128xf32>, vector<18x128xf32> -> vector<18x128xf32>
    %cst_9 = arith.constant dense<0.000000e+00> : vector<64x128xf32>
    %18 = tpu.matmul %14, %15, %cst_9 {dimension_numbers = #tpu.dot_dimension_numbers<[1], [0], [0], [1], [0, 0, 1, 1], [], []>} : vector<64x128xf32>, vector<128x128xf32>, vector<64x128xf32> -> vector<64x128xf32>
    %c18 = arith.constant 18 : index
    %c0_10 = arith.constant 0 : index
    %19 = vector.load %arg2[%c18, %c0_10] : memref<36x64xf32, #tpu.memory_space<vmem>>, vector<18x64xf32>
    %cst_11 = arith.constant dense<0.000000e+00> : vector<18x128xf32>
    %20 = tpu.matmul %19, %18, %cst_11 {dimension_numbers = #tpu.dot_dimension_numbers<[1], [0], [0], [1], [0, 0, 1, 1], [], []>} : vector<18x64xf32>, vector<64x128xf32>, vector<18x128xf32> -> vector<18x128xf32>
    %21 = arith.addf %17, %20 : vector<18x128xf32>
    %c0_12 = arith.constant 0 : index
    %c2 = arith.constant 2 : index
    %22 = vector.load %arg3[%c0_12, %c2] : memref<64x4xf32, #tpu.memory_space<vmem>>, vector<18x1xf32>
    %23 = vector.broadcast %22 : vector<18x1xf32> to vector<18x128xf32>
    %24 = arith.addf %21, %23 : vector<18x128xf32>
    %25 = vector.extract_strided_slice %24 {offsets = [0, 0], sizes = [2, 128], strides = [1, 1]} : vector<18x128xf32> to vector<2x128xf32>
    %c17_i32 = arith.constant 17 : i32
    %26 = tpu.dynamic_rotate %25 by %c17_i32 dim 1 : vector<2x128xf32>, i32 -> vector<2x128xf32>
    %c128 = arith.constant 128 : index
    %c0_13 = arith.constant 0 : index
    %27 = vector.load %arg1[%c128, %c0_13] : memref<137x128xf32, #tpu.memory_space<vmem>>, vector<1x128xf32>
    %28 = vector.broadcast %27 : vector<1x128xf32> to vector<2x128xf32>
    %29 = arith.mulf %26, %28 : vector<2x128xf32>
    %30 = vector.extract_strided_slice %24 {offsets = [2, 0], sizes = [2, 128], strides = [1, 1]} : vector<18x128xf32> to vector<2x128xf32>
    %c16_i32 = arith.constant 16 : i32
    %31 = tpu.dynamic_rotate %30 by %c16_i32 dim 1 : vector<2x128xf32>, i32 -> vector<2x128xf32>
    %c129 = arith.constant 129 : index
    %c0_14 = arith.constant 0 : index
    %32 = vector.load %arg1[%c129, %c0_14] : memref<137x128xf32, #tpu.memory_space<vmem>>, vector<1x128xf32>
    %33 = vector.broadcast %32 : vector<1x128xf32> to vector<2x128xf32>
    %34 = arith.mulf %31, %33 : vector<2x128xf32>
    %35 = arith.addf %29, %34 : vector<2x128xf32>
    %36 = vector.extract_strided_slice %24 {offsets = [4, 0], sizes = [2, 128], strides = [1, 1]} : vector<18x128xf32> to vector<2x128xf32>
    %c15_i32 = arith.constant 15 : i32
    %37 = tpu.dynamic_rotate %36 by %c15_i32 dim 1 : vector<2x128xf32>, i32 -> vector<2x128xf32>
    %c130 = arith.constant 130 : index
    %c0_15 = arith.constant 0 : index
    %38 = vector.load %arg1[%c130, %c0_15] : memref<137x128xf32, #tpu.memory_space<vmem>>, vector<1x128xf32>
    %39 = vector.broadcast %38 : vector<1x128xf32> to vector<2x128xf32>
    %40 = arith.mulf %37, %39 : vector<2x128xf32>
    %41 = arith.addf %35, %40 : vector<2x128xf32>
    %42 = vector.extract_strided_slice %24 {offsets = [6, 0], sizes = [2, 128], strides = [1, 1]} : vector<18x128xf32> to vector<2x128xf32>
    %c1_i32 = arith.constant 1 : i32
    %43 = tpu.dynamic_rotate %42 by %c1_i32 dim 1 : vector<2x128xf32>, i32 -> vector<2x128xf32>
    %c131 = arith.constant 131 : index
    %c0_16 = arith.constant 0 : index
    %44 = vector.load %arg1[%c131, %c0_16] : memref<137x128xf32, #tpu.memory_space<vmem>>, vector<1x128xf32>
    %45 = vector.broadcast %44 : vector<1x128xf32> to vector<2x128xf32>
    %46 = arith.mulf %43, %45 : vector<2x128xf32>
    %47 = arith.addf %41, %46 : vector<2x128xf32>
    %48 = vector.extract_strided_slice %24 {offsets = [8, 0], sizes = [2, 128], strides = [1, 1]} : vector<18x128xf32> to vector<2x128xf32>
    %49 = arith.addf %47, %48 : vector<2x128xf32>
    %50 = vector.extract_strided_slice %24 {offsets = [10, 0], sizes = [2, 128], strides = [1, 1]} : vector<18x128xf32> to vector<2x128xf32>
    %c127_i32 = arith.constant 127 : i32
    %51 = tpu.dynamic_rotate %50 by %c127_i32 dim 1 : vector<2x128xf32>, i32 -> vector<2x128xf32>
    %c133 = arith.constant 133 : index
    %c0_17 = arith.constant 0 : index
    %52 = vector.load %arg1[%c133, %c0_17] : memref<137x128xf32, #tpu.memory_space<vmem>>, vector<1x128xf32>
    %53 = vector.broadcast %52 : vector<1x128xf32> to vector<2x128xf32>
    %54 = arith.mulf %51, %53 : vector<2x128xf32>
    %55 = arith.addf %49, %54 : vector<2x128xf32>
    %56 = vector.extract_strided_slice %24 {offsets = [12, 0], sizes = [2, 128], strides = [1, 1]} : vector<18x128xf32> to vector<2x128xf32>
    %c113_i32 = arith.constant 113 : i32
    %57 = tpu.dynamic_rotate %56 by %c113_i32 dim 1 : vector<2x128xf32>, i32 -> vector<2x128xf32>
    %c134 = arith.constant 134 : index
    %c0_18 = arith.constant 0 : index
    %58 = vector.load %arg1[%c134, %c0_18] : memref<137x128xf32, #tpu.memory_space<vmem>>, vector<1x128xf32>
    %59 = vector.broadcast %58 : vector<1x128xf32> to vector<2x128xf32>
    %60 = arith.mulf %57, %59 : vector<2x128xf32>
    %61 = arith.addf %55, %60 : vector<2x128xf32>
    %62 = vector.extract_strided_slice %24 {offsets = [14, 0], sizes = [2, 128], strides = [1, 1]} : vector<18x128xf32> to vector<2x128xf32>
    %c112_i32 = arith.constant 112 : i32
    %63 = tpu.dynamic_rotate %62 by %c112_i32 dim 1 : vector<2x128xf32>, i32 -> vector<2x128xf32>
    %c135 = arith.constant 135 : index
    %c0_19 = arith.constant 0 : index
    %64 = vector.load %arg1[%c135, %c0_19] : memref<137x128xf32, #tpu.memory_space<vmem>>, vector<1x128xf32>
    %65 = vector.broadcast %64 : vector<1x128xf32> to vector<2x128xf32>
    %66 = arith.mulf %63, %65 : vector<2x128xf32>
    %67 = arith.addf %61, %66 : vector<2x128xf32>
    %68 = vector.extract_strided_slice %24 {offsets = [16, 0], sizes = [2, 128], strides = [1, 1]} : vector<18x128xf32> to vector<2x128xf32>
    %c111_i32 = arith.constant 111 : i32
    %69 = tpu.dynamic_rotate %68 by %c111_i32 dim 1 : vector<2x128xf32>, i32 -> vector<2x128xf32>
    %c136 = arith.constant 136 : index
    %c0_20 = arith.constant 0 : index
    %70 = vector.load %arg1[%c136, %c0_20] : memref<137x128xf32, #tpu.memory_space<vmem>>, vector<1x128xf32>
    %71 = vector.broadcast %70 : vector<1x128xf32> to vector<2x128xf32>
    %72 = arith.mulf %69, %71 : vector<2x128xf32>
    %73 = arith.addf %67, %72 : vector<2x128xf32>
    %c0_21 = arith.constant 0 : index
    %c3 = arith.constant 3 : index
    %74 = vector.load %arg3[%c0_21, %c3] : memref<64x4xf32, #tpu.memory_space<vmem>>, vector<1x1xf32>
    %75 = vector.broadcast %74 : vector<1x1xf32> to vector<2x128xf32>
    %76 = arith.addf %73, %75 : vector<2x128xf32>
    %cst_22 = arith.constant 0.00999999977 : f32
    %77 = vector.broadcast %cst_22 : f32 to vector<2x128xf32>
    %78 = arith.mulf %77, %76 : vector<2x128xf32>
    %79 = arith.maximumf %76, %78 : vector<2x128xf32>
    %c0_23 = arith.constant 0 : index
    %c0_24 = arith.constant 0 : index
    %80 = vector.load %arg4[%c0_23, %c0_24] : memref<2x128xf32, #tpu.memory_space<vmem>>, vector<2x128xf32>
    tpu.vector_store %arg4[%c0_23, %c0_24], %79 {strides = array<i32>} : memref<2x128xf32, #tpu.memory_space<vmem>>, vector<2x128xf32>,
    return
  }
}

</mosaic_0001>

<bundles_post_ra>
// kernel: tpu_custom_call.1
= control target key start
LH: loop header
LB: loop body
LE: loop exit
PB: predicated region body
PF: predicated region fallthrough
CT: control target
= control target key end

     0   :  { %9 = vsyncpa [#allocation3], 0  ;;  %s1064_s0 = inlined_call_operand.vmem [shape: f32[2,128], index: 0, kind: input, shape index: {}]   ;;  %s1065_s1 = inlined_call_operand.hbm [shape: f32[137,128], index: 1, kind: input, shape index: {}]   ;;  %s1066_s2 = inlined_call_operand.vmem [shape: f32[36,64], index: 2, kind: input, shape index: {}]   ;;  %s1067_s3 = inlined_call_operand.vmem [shape: f32[64,4], index: 3, kind: input, shape index: {}]   ;;  %s1068_s4 = inlined_call_operand.hbm [shape: f32[2,128], index: 4, kind: output, shape index: {}]  }
   0x1   :  { %10 = vsyncpa [#allocation4], 0  ;;  %s886_s15 = smov [#allocation2]   ;;  %s838_s19 = scalar_lea.hbm %s1065_s1, 2304 }
   0x2   :  { %s18_s16 = sshll.u32 %s886_s15, 4  ;;  %p839_p0 = scmp.ne.s32.totalorder %s1065_s1, %s838_s19  ;;  %s19_s16 = int_to_ptr.vmem [resolvable:$true] %s18_s16 }
   0x3   :  { %p842_p1 = scmp.lt.u32.totalorder %s838_s19, %s1065_s1 }
   0x5   :  { %p844_p2 = pnand %p842_p1, %p839_p0 }
   0x7   :  { %847 = shalt.err (!%p844_p2)
}
   0x8   :  { %s848_s24 = scalar_lea.vmem %s19_s16, 2304  ;;  %p853_p4 = scmp.lt.s32.totalorder %s19_s16, %s19_s16 }
   0x9   :  { %p849_p3 = scmp.ne.s32.totalorder %s19_s16, %s848_s24  ;;  %p854_p5 = scmp.lt.s32.totalorder %s848_s24, %s848_s24 }
   0xb   :  { %p855_p6 = por %p854_p5, %p853_p4 }
   0xd   :  { %p856_p7 = pnand %p855_p6, %p849_p3 }
   0xf   :  { %859 = shalt.err (!%p856_p7)
}
  0x10   :  { %s887_s25 = smov 128   ;;  %s888_s26 = smov 8  }
  0x11   :  { %24 = dma.hbm_to_vmem [thread:$0]  %s1065_s1, 2304, %s19_s16, [#allocation3], %s887_s25, %s887_s25, %s888_s26  }
  0x12   :  { %882 = dma.done.wait [#allocation3], 2304  }
  0x13   :  { %883 = vsyncadd [#allocation3], 4294964992  ;;  %v889_v0 = vmov 1   ;;  %v890_v1 = vmov 0   ;;  %v947_v2 = vld [vmem:[%s1067_s3] sm:$0xff]  ;;  %v954_v3 = vld [vmem:[%s1067_s3 + $0x8] sm:$0xff] }
  0x14   :  { %826 = vset.pattern.permute.xlu1 %v889_v0  ;;  %825 = vset.pattern.permute.xlu0 %v890_v1  ;;  %v45_v4 = vld [vmem:[%s1067_s3 + $0x10] sm:$0xff]  ;;  %v155_v5 = vld [vmem:[#allocation2] sm:$0xff]  ;;  %v156_v6 = vld [vmem:[#allocation2 + $0x8] sm:$0xff]  ;;  %vm36_vm0 = vcmask 1041408   ;;  %vm41_vm1 = vcmask 1043456   ;;  %vm892_vm2 = vmmov 0  }
  0x15   :  { %100 = vperm.xlu1 %826, %v947_v2   ;;  %53 = vperm.xlu0 %825, %v947_v2   ;;  %v157_v7 = vld [vmem:[#allocation2 + $0x10] sm:$0xff]  ;;  %v158_v8 = vld [vmem:[#allocation2 + $0x18] sm:$0xff]  ;;  %v748_v9 = vpack.c.bf16 %v156_v6, %v155_v5  ;;  %v159_v11 = vld [vmem:[#allocation2 + $0x20] sm:$0xff]  ;;  %s895_s23 = smov 125   ;;  %vm282_vm3 = vcmask 523264   ;;  %s897_s8 = smov 16  }
  0x16   :  { %v752_v10 = vpack.c.bf16 %v158_v8, %v157_v7  ;;  %v160_v12 = vld [vmem:[#allocation2 + $0x28] sm:$0xff]  ;;  %v46_v13 = vld [vmem:[%s1067_s3 + $0x18] sm:$0xff]  ;;  %v161_v15 = vld [vmem:[#allocation2 + $0x30] sm:$0xff]  ;;  %s898_s9 = smov 15   ;;  %s899_s10 = smov 1  }
  0x17   :  { %749 = vmatprep.subr.bf16.mxu0 %v748_v9  ;;  %v756_v14 = vpack.c.bf16 %v160_v12, %v159_v11  ;;  %v162_v16 = vld [vmem:[#allocation2 + $0x38] sm:$0xff]  ;;  %v163_v18 = vld [vmem:[#allocation2 + $0x40] sm:$0xff]  ;;  %v164_v19 = vld [vmem:[#allocation2 + $0x48] sm:$0xff]  ;;  %s900_s11 = smov 127   ;;  %s901_s12 = smov 113  }
  0x18   :  { %751 = vmatpush3.bf16.msra.mxu0 %v748_v9  ;;  %v760_v17 = vpack.c.bf16 %v162_v16, %v161_v15  ;;  %v48_v20 = vld [vmem:[%s1067_s3 + $0x28] sm:$0xff]  ;;  %v47_v21 = vld [vmem:[%s1067_s3 + $0x20] sm:$0xff]  ;;  %v764_v22 = vpack.c.bf16 %v164_v19, %v163_v18  ;;  %v165_v23 = vld [vmem:[#allocation2 + $0x50] sm:$0xff]  ;;  %s902_s13 = smov 112   ;;  %s903_s14 = smov 111  }
  0x19   :  { %104 = vperm.xlu1 %826, %v954_v3   ;;  %828 = vset.pattern.permute.xlu0 %v889_v0  ;;  %v166_v24 = vld [vmem:[#allocation2 + $0x58] sm:$0xff]  ;;  %v49_v25 = vld [vmem:[%s1067_s3 + $0x30] sm:$0xff]  ;;  %v167_v27 = vld [vmem:[#allocation2 + $0x60] sm:$0xff]  ;;  %s904_s16 = smov [#allocation5]  }
  0x1a   :  { %108 = vperm.xlu0 %828, %v45_v4   ;;  %753 = vmatprep.subr.bf16.mxu0 %v752_v10  ;;  %v768_v26 = vpack.c.bf16 %v166_v24, %v165_v23  ;;  %v168_v28 = vld [vmem:[#allocation2 + $0x68] sm:$0xff]  ;;  %v169_v30 = vld [vmem:[#allocation2 + $0x70] sm:$0xff]  ;;  %v170_v31 = vld [vmem:[#allocation2 + $0x78] sm:$0xff]  ;;  %s585_s17 = sshll.u32 %s904_s16, 4  ;;  %s586_s17 = int_to_ptr.vmem [resolvable:$true] %s585_s17 }
  0x1b   :  { %v772_v29 = vpack.c.bf16 %v168_v28, %v167_v27  ;;  %v776_v32 = vpack.c.bf16 %v170_v31, %v169_v30  ;;  %v50_v33 = vld [vmem:[%s1067_s3 + $0x38] sm:$0xff]  ;;  %v32_v34 = vld [vmem:[%s1064_s0] sm:$0x3]  ;;  %v893_v30 = vmov 0.0   ;;  %v894_v31 = vmov 2   ;;  %s860_s18 = scalar_lea.vmem %s586_s17, 32  ;;  %p865_p9 = scmp.lt.s32.totalorder %s586_s17, %s586_s17 }
  0x1c   :  { %755 = vmatpush3.bf16.msra.mxu0 %v752_v10  ;;  %v34_v35 = vrot.slane %v32_v34, 6  ;;  %714 = vmatprep.mubr.msk.f32.mxu1 %vm892_vm2, %v893_v30  ;;  %p861_p8 = scmp.ne.s32.totalorder %s586_s17, %s860_s18  ;;  %p866_p10 = scmp.lt.s32.totalorder %s860_s18, %s860_s18 }
  0x1d   :  { %827 = vset.pattern.permute.xlu1 %v890_v1  ;;  %757 = vmatprep.subr.bf16.mxu0 %v756_v14 }
  0x1e   :  { %68 = vperm.xlu1 %827, %v46_v13   ;;  %829 = vset.pattern.permute.xlu0 %v890_v1  ;;  %v37_v36 = vsel %vm36_vm0, %v32_v34, %v34_v35  ;;  %p867_p11 = por %p866_p10, %p865_p9 }
  0x1f   :  { %58 = vperm.xlu0 %829, %v954_v3   ;;  %v39_v37 = vrot.slane %v37_v36, 4 }
  0x20   :  { %759 = vmatpush3.bf16.msra.mxu0 %v756_v14  ;;  %p868_p12 = pnand %p867_p11, %p861_p8 }
  0x21   :  { %761 = vmatprep.subr.bf16.mxu0 %v760_v17  ;;  %v42_v38 = vsel %vm41_vm1, %v37_v36, %v39_v37 }
  0x22   :  { %830 = vset.pattern.permute.xlu1 %v889_v0 }
  0x23   :  { %112 = vperm.xlu1 %830, %v46_v13   ;;  %63 = vperm.xlu0 %829, %v45_v4  }
  0x24   :  { %763 = vmatpush3.bf16.msra.mxu0 %v760_v17 }
  0x25   :  { %765 = vmatprep.subr.bf16.mxu0 %v764_v22 }
  0x27   :  { %831 = vset.pattern.permute.xlu1 %v890_v1  ;;  %78 = vperm.xlu0 %829, %v48_v20  }
  0x28   :  { %73 = vperm.xlu1 %831, %v47_v21   ;;  %767 = vmatpush3.bf16.msra.mxu0 %v764_v22 }
  0x29   :  { %769 = vmatprep.subr.bf16.mxu0 %v768_v26 }
  0x2b   :  { %83 = vperm.xlu0 %829, %v49_v25  }
  0x2c   :  { %832 = vset.pattern.permute.xlu1 %v889_v0  ;;  %771 = vmatpush3.bf16.msra.mxu0 %v768_v26 }
  0x2d   :  { %116 = vperm.xlu1 %832, %v47_v21   ;;  %773 = vmatprep.subr.bf16.mxu0 %v772_v29 }
  0x2f   :  { %834 = vset.pattern.permute.xlu0 %v889_v0 }
  0x30   :  { %124 = vperm.xlu0 %834, %v49_v25   ;;  %775 = vmatpush3.bf16.msra.mxu0 %v772_v29  ;;  %v891_v29 = vmov 0.0|0.0  }
  0x31   :  { %120 = vperm.xlu1 %832, %v48_v20   ;;  %777 = vmatprep.subr.bf16.mxu0 %v776_v32 }
  0x32   :  { %780 = vmatprep.subr.bf16.mxu1 %v891_v29 }
  0x34   :  { %779 = vmatpush3.bf16.msra.mxu0 %v776_v32  ;;  %837 = vset.pattern.permute.xlu0 %v894_v31  ;;  %v463_v32 = vld [vmem:[%s1067_s3 + $0x10] sm:$0x3] }
  0x35   :  { %833 = vset.pattern.permute.xlu1 %v890_v1  ;;  %471 = vperm.xlu0 %837, %v954_v3  }
  0x36   :  { %88 = vperm.xlu1 %833, %v50_v33  }
  0x3a   :  { %835 = vset.pattern.permute.xlu1 %v889_v0 }
  0x3b   :  { %128 = vperm.xlu1 %835, %v50_v33   ;;  %v568_v33 = vld [vmem:[%s1067_s3] sm:$0x1] }
  0x3f   :  { %836 = vset.pattern.permute.xlu1 %v894_v31 }
  0x40   :  { %466 = vperm.xlu1 %836, %v947_v2  }
  0x44   :  { %476 = vperm.xlu1 %836, %v463_v32  }
  0x48   :  { %570 = vrot.lane.b32.xlu1 %v568_v33, %s895_s23  ;;  %v605_v33 = vld [vmem:[#allocation2 + $0x86] ss:$0 sm:$0xff] }
  0x94   :  { %v101_v39 = vpop.permute.xlu1 %100  ;;  %v54_v40 = vpop.permute.xlu0 %53 }
  0x95   :  { %v91_v41 = vmul.f32 %v54_v40, %v42_v38 }
  0x97   :  { %v131_v42 = vadd.f32 %v101_v39, %v91_v41 }
  0x98   :  { %v105_v43 = vpop.permute.xlu1 %104 }
  0x99   :  { %v109_v44 = vpop.permute.xlu0 %108  ;;  %v139_v45 = vmul.f32 0.01, %v131_v42 }
  0x9b   :  { %v988_v46 = vmax.f32 %v131_v42, %v139_v45  ;;  %v280_v45 = vld [vmem:[%s1066_s2 + $0x1a] sm:$0xff] }
  0x9d   :  { %v69_v47 = vpop.permute.xlu1 %68  ;;  %686 = vmatprep.mubr.f32.mxu0 %v988_v46 }
  0x9e   :  { %v59_v48 = vpop.permute.xlu0 %58  ;;  %v94_v50 = vmul.f32 %v69_v47, %v42_v38  ;;  %v171_v47 = vld [vmem:[%s1066_s2] sm:$0xff] }
  0x9f   :  { %v92_v49 = vmul.f32 %v59_v48, %v42_v38  ;;  %v172_v48 = vld [vmem:[%s1066_s2 + $0x8] sm:$0xff] }
  0xa1   :  { %v132_v51 = vadd.f32 %v105_v43, %v92_v49  ;;  %v173_v49 = vld [vmem:[%s1066_s2 + $0x10] sm:$0x3] }
  0xa2   :  { %v113_v52 = vpop.permute.xlu1 %112  ;;  %v64_v53 = vpop.permute.xlu0 %63 }
  0xa3   :  { %v140_v54 = vmul.f32 0.01, %v132_v51  ;;  %v134_v55 = vadd.f32 %v113_v52, %v94_v50  ;;  %v93_v56 = vmul.f32 %v64_v53, %v42_v38 }
  0xa5   :  { %v142_v57 = vmul.f32 0.01, %v134_v55  ;;  %v133_v58 = vadd.f32 %v109_v44, %v93_v56  ;;  %v991_v59 = vmax.f32 %v132_v51, %v140_v54  ;;  %v279_v44 = vld [vmem:[%s1066_s2 + $0x12] sm:$0xff] }
  0xa6   :  { %v79_v60 = vpop.permute.xlu0 %78 }
  0xa7   :  { %v141_v61 = vmul.f32 0.01, %v133_v58  ;;  %v74_v62 = vpop.permute.xlu1 %73  ;;  %687 = vmatmul.mubr.f32.vlgmr.msra.gmra.mrb[0].mxu0 %v991_v59  ;;  %v793_v63 = vpack.c.bf16 %v991_v59, %v988_v46  ;;  %v996_v0 = vmax.f32 %v134_v55, %v142_v57  ;;  %v96_v10 = vmul.f32 %v79_v60, %v42_v38  ;;  %v281_v46 = vld [vmem:[%s1066_s2 + $0x22] sm:$0x3]  ;;  %s896_s2 = smov 17  }
  0xa8   :  { %v95_v5 = vmul.f32 %v74_v62, %v42_v38 }
  0xa9   :  { %v998_v1 = vmax.f32 %v133_v58, %v141_v61 }
  0xaa   :  { %v84_v4 = vpop.permute.xlu0 %83 }
  0xab   :  { %689 = vmatprep.mubr.f32.mxu0 %v998_v1  ;;  %v796_v6 = vpack.c.bf16 %v996_v0, %v998_v1  ;;  %v97_v9 = vmul.f32 %v84_v4, %v42_v38 }
  0xac   :  { %v117_v7 = vpop.permute.xlu1 %116  ;;  %690 = vmatmul.mubr.f32.gmra.mrb[2].mxu0 %v996_v0 }
  0xad   :  { %v135_v8 = vadd.f32 %v117_v7, %v95_v5 }
  0xaf   :  { %v143_v11 = vmul.f32 0.01, %v135_v8  ;;  %v125_v12 = vpop.permute.xlu0 %124 }
  0xb0   :  { %v137_v13 = vadd.f32 %v125_v12, %v97_v9  ;;  %v121_v14 = vpop.permute.xlu1 %120 }
  0xb1   :  { %v1004_v15 = vmax.f32 %v135_v8, %v143_v11  ;;  %v136_v16 = vadd.f32 %v121_v14, %v96_v10 }
  0xb2   :  { %v145_v17 = vmul.f32 0.01, %v137_v13 }
  0xb3   :  { %v144_v18 = vmul.f32 0.01, %v136_v16  ;;  %692 = vmatprep.mubr.f32.mxu0 %v1004_v15 }
  0xb4   :  { %v153_v21 = vmax.f32 %v137_v13, %v145_v17  ;;  %v472_v0 = vpop.permute.xlu0 %471 }
  0xb5   :  { %v152_v19 = vmax.f32 %v136_v16, %v144_v18  ;;  %v89_v20 = vpop.permute.xlu1 %88  ;;  %v600_v16 = vld [vmem:[#allocation2 + $0x80] ss:$0 sm:$0xff]  ;;  %v601_v18 = vld [vmem:[#allocation2 + $0x81] ss:$0 sm:$0xff] }
  0xb6   :  { %v98_v23 = vmul.f32 %v89_v20, %v42_v38  ;;  %v602_v20 = vld [vmem:[#allocation2 + $0x82] ss:$0 sm:$0xff] }
  0xb7   :  { %v799_v22 = vpack.c.bf16 %v152_v19, %v1004_v15  ;;  %693 = vmatmul.mubr.f32.gmra.mrb[4].mxu0 %v152_v19 }
  0xb8   :  { %695 = vmatprep.mubr.f32.mxu0 %v153_v21 }
  0xba   :  { %v129_v24 = vpop.permute.xlu1 %128 }
  0xbb   :  { %v138_v25 = vadd.f32 %v129_v24, %v98_v23  ;;  %v603_v24 = vld [vmem:[#allocation2 + $0x83] ss:$0 sm:$0xff] }
  0xbd   :  { %v146_v26 = vmul.f32 0.01, %v138_v25 }
  0xbf   :  { %v154_v27 = vmax.f32 %v138_v25, %v146_v26  ;;  %v467_v50 = vpop.permute.xlu1 %466 }
  0xc1   :  { %v802_v28 = vpack.c.bf16 %v154_v27, %v153_v21  ;;  %696 = vmatmul.mubr.f32.gmra.mrb[6].mxu0 %v154_v27 }
  0xc3   :  { %v477_v51 = vpop.permute.xlu1 %476 }
  0xc7   :  { %v571_v52 = vpop.permute.xlu1 %570 }
  0xc8   :  { %804 = vpush %v571_v52 }
  0xf9   :  { %s805_s15 = spop %804 }
 0x17a   :  { %v688_v34 = vpop.f32.mrb[0].mxu0 }
 0x17b   :  { %v240_v35 = vpop.f32.mrb[1].mxu0 }
 0x17c   :  { %v781_v36 = vpack.c.bf16 %v688_v34, %v240_v35 }
 0x17e   :  { %782 = vmatpush3.bf16.msra.mxu1 %v781_v36 }
 0x17f   :  { %v691_v37 = vpop.f32.mrb[2].mxu0  ;;  %783 = vmatprep.subr.bf16.mxu1 %v891_v29 }
 0x180   :  { %v250_v2 = vpop.f32.mrb[3].mxu0 }
 0x181   :  { %v784_v38 = vpack.c.bf16 %v691_v37, %v250_v2  ;;  %v606_v37 = vld [vmem:[#allocation2 + $0x87] ss:$0 sm:$0xff] }
 0x183   :  { %785 = vmatpush3.bf16.msra.mxu1 %v784_v38 }
 0x184   :  { %786 = vmatprep.subr.bf16.mxu1 %v891_v29 }
 0x18a   :  { %v694_v3 = vpop.f32.mrb[4].mxu0 }
 0x18b   :  { %v260_v39 = vpop.f32.mrb[5].mxu0 }
 0x18c   :  { %v787_v40 = vpack.c.bf16 %v694_v3, %v260_v39  ;;  %v607_v39 = vld [vmem:[#allocation2 + $0x88] ss:$0 sm:$0xff] }
 0x18e   :  { %788 = vmatpush3.bf16.msra.mxu1 %v787_v40 }
 0x18f   :  { %789 = vmatprep.subr.bf16.mxu1 %v891_v29 }
 0x194   :  { %v697_v41 = vpop.f32.mrb[6].mxu0 }
 0x195   :  { %v270_v42 = vpop.f32.mrb[7].mxu0 }
 0x196   :  { %v790_v43 = vpack.c.bf16 %v697_v41, %v270_v42 }
 0x198   :  { %791 = vmatpush3.bf16.msra.mxu1 %v790_v43 }
 0x199   :  { %792 = vmatprep.subr.bf16.mxu1 %v891_v29 }
 0x19b   :  { %715 = vmatmul.mubr.msk.f32.vlgmr.msra.gmra.mrb[0].mxu1 %vm282_vm3, %v279_v44 }
 0x19c   :  { %794 = vmatpush3.bf16.msra.mxu1 %v793_v63  ;;  %717 = vmatprep.mubr.msk.f32.mxu1 %vm892_vm2, %v893_v30 }
 0x19d   :  { %795 = vmatprep.subr.bf16.mxu1 %v891_v29 }
 0x19f   :  { %718 = vmatmul.mubr.msk.f32.gmra.mrb[2].mxu1 %vm282_vm3, %v280_v45  ;;  %v573_v45 = vstv %s805_s15 }
 0x1a0   :  { %797 = vmatpush3.bf16.msra.mxu1 %v796_v6  ;;  %720 = vmatprep.mubr.msk.f32.mxu1 %vm892_vm2, %v893_v30 }
 0x1a1   :  { %798 = vmatprep.subr.bf16.mxu1 %v891_v29 }
 0x1a3   :  { %721 = vmatmul.mubr.msk.f32.gmra.mrb[4].mxu1 %vm282_vm3, %v281_v46 }
 0x1a4   :  { %800 = vmatpush3.bf16.msra.mxu1 %v799_v22  ;;  %739 = vmatprep.mubr.msk.f32.mxu1 %vm892_vm2, %v893_v30 }
 0x1a5   :  { %801 = vmatprep.subr.bf16.mxu1 %v891_v29 }
 0x1a8   :  { %803 = vmatpush3.bf16.msra.mxu1 %v802_v28 }
 0x1ab   :  { %740 = vmatmul.mubr.msk.f32.vlgmr.msra.gmra.mrb[6].mxu1 %vm282_vm3, %v171_v47 }
 0x1ac   :  { %742 = vmatprep.mubr.msk.f32.mxu1 %vm892_vm2, %v893_v30 }
 0x1af   :  { %743 = vmatmul.mubr.msk.f32.gmra.mrb[8].mxu1 %vm282_vm3, %v172_v48 }
 0x1b0   :  { %745 = vmatprep.mubr.msk.f32.mxu1 %vm892_vm2, %v893_v30  ;;  %v604_v30 = vld [vmem:[#allocation2 + $0x85] ss:$0 sm:$0xff] }
 0x1b3   :  { %746 = vmatmul.mubr.msk.f32.gmra.mrb[10].mxu1 %vm282_vm3, %v173_v49 }
 0x26e   :  { %v358_v53 = vpop.f32.mrb[0].mxu1 }
 0x26f   :  { %v716_v54 = vpop.f32.mrb[1].mxu1 }
 0x272   :  { %v363_v55 = vpop.f32.mrb[2].mxu1 }
 0x273   :  { %v719_v56 = vpop.f32.mrb[3].mxu1 }
 0x276   :  { %v368_v57 = vpop.f32.mrb[4].mxu1 }
 0x277   :  { %v722_v58 = vpop.f32.mrb[5].mxu1 }
 0x27e   :  { %v447_v59 = vpop.f32.mrb[6].mxu1 }
 0x27f   :  { %v448_v60 = vadd.f32 %v447_v59, %v358_v53  ;;  %v741_v61 = vpop.f32.mrb[7].mxu1 }
 0x281   :  { %v479_v62 = vadd.f32 %v467_v50, %v448_v60 }
 0x282   :  { %v452_v63 = vpop.f32.mrb[8].mxu1 }
 0x283   :  { %v453_v1 = vadd.f32 %v452_v63, %v363_v55  ;;  %482 = vrot.lane.b32.xlu0 %v479_v62, %s896_s2  ;;  %v491_v4 = vrot.slane %v479_v62, 2  ;;  %v744_v5 = vpop.f32.mrb[9].mxu1  ;;  %v502_v7 = vrot.slane %v479_v62, 4  ;;  %v513_v10 = vrot.slane %v479_v62, 6 }
 0x285   :  { %v480_v6 = vadd.f32 %v472_v0, %v453_v1  ;;  %493 = vrot.lane.b32.xlu1 %v491_v4, %s897_s8 }
 0x286   :  { %v457_v8 = vpop.f32.mrb[10].mxu1 }
 0x287   :  { %v458_v9 = vadd.f32 %v457_v8, %v368_v57  ;;  %504 = vrot.lane.b32.xlu0 %v502_v7, %s898_s9  ;;  %v747_v11 = vpop.f32.mrb[11].mxu1  ;;  %v526_v12 = vrot.slane %v480_v6, 2  ;;  %v537_v13 = vrot.slane %v480_v6, 4  ;;  %v548_v14 = vrot.slane %v480_v6, 6 }
 0x289   :  { %515 = vrot.lane.b32.xlu1 %v513_v10, %s899_s10  ;;  %v481_v15 = vadd.f32 %v477_v51, %v458_v9 }
 0x28b   :  { %528 = vrot.lane.b32.xlu0 %v526_v12, %s900_s11 }
 0x28d   :  { %539 = vrot.lane.b32.xlu1 %v537_v13, %s901_s12 }
 0x28f   :  { %550 = vrot.lane.b32.xlu0 %v548_v14, %s902_s13 }
 0x291   :  { %559 = vrot.lane.b32.xlu1 %v481_v15, %s903_s14 }
 0x2f5   :  { %v483_v17 = vpop.permute.xlu0 %482 }
 0x2f6   :  { %v489_v21 = vmul.f32 %v600_v16, %v483_v17 }
 0x2f7   :  { %v494_v19 = vpop.permute.xlu1 %493 }
 0x2f8   :  { %v500_v22 = vmul.f32 %v601_v18, %v494_v19 }
 0x2f9   :  { %v505_v23 = vpop.permute.xlu0 %504 }
 0x2fa   :  { %v501_v25 = vadd.f32 %v500_v22, %v489_v21  ;;  %v511_v26 = vmul.f32 %v602_v20, %v505_v23 }
 0x2fb   :  { %v516_v27 = vpop.permute.xlu1 %515 }
 0x2fc   :  { %v512_v28 = vadd.f32 %v511_v26, %v501_v25  ;;  %v522_v29 = vmul.f32 %v603_v24, %v516_v27 }
 0x2fd   :  { %v529_v31 = vpop.permute.xlu0 %528 }
 0x2fe   :  { %v523_v32 = vadd.f32 %v522_v29, %v512_v28  ;;  %v535_v36 = vmul.f32 %v604_v30, %v529_v31 }
 0x2ff   :  { %v540_v34 = vpop.permute.xlu1 %539 }
 0x300   :  { %v524_v35 = vadd.f32 %v523_v32, %v480_v6  ;;  %v546_v3 = vmul.f32 %v605_v33, %v540_v34 }
 0x301   :  { %v551_v2 = vpop.permute.xlu0 %550 }
 0x302   :  { %v536_v38 = vadd.f32 %v535_v36, %v524_v35  ;;  %v557_v42 = vmul.f32 %v606_v37, %v551_v2 }
 0x303   :  { %v560_v40 = vpop.permute.xlu1 %559 }
 0x304   :  { %v547_v41 = vadd.f32 %v546_v3, %v536_v38  ;;  %v566_v44 = vmul.f32 %v607_v39, %v560_v40 }
 0x306   :  { %v558_v43 = vadd.f32 %v557_v42, %v547_v41 }
 0x308   :  { %v567_v46 = vadd.f32 %v566_v44, %v558_v43 }
 0x30a   :  { %v575_v47 = vadd.f32 %v573_v45, %v567_v46 }
 0x30c   :  { %v576_v48 = vmul.f32 0.01, %v575_v47 }
 0x30e   :  { %v577_v49 = vmax.f32 %v575_v47, %v576_v48 }
 0x310   :  { %578 = vst [vmem:[#allocation5] sm:$0x3] %v577_v49 }
 0x311   :  { %871 = shalt.err (!%p868_p12)
}
 0x312   :  { %s872_s20 = scalar_lea.hbm %s1068_s4, 32 }
 0x313   :  { %p873_p13 = scmp.ne.s32.totalorder %s1068_s4, %s872_s20  ;;  %p876_p0 = scmp.lt.u32.totalorder %s872_s20, %s1068_s4 }
 0x315   :  { %p878_p1 = pnand %p876_p0, %p873_p13 }
 0x317   :  { %881 = shalt.err (!%p878_p1)
}
 0x318   :  { %588 = dma.vmem_to_hbm [thread:$0]  %s586_s17, 32, %s1068_s4, [#allocation4]  }
 0x319   :  { %884 = dma.done.wait [#allocation4], 32  }
 0x31a   :  { %885 = vsyncadd [#allocation4], 4294967264 }
 0x31b   :  { %592 = vsyncpa [#allocation3], 1 }
 0x31c   :  { %593 = vsyncpa [#allocation4], 1 }

</bundles_post_ra>
